<compile_context>
chip_gen: v7x
topology: tpu7x:2x2x1
jax: 0.10.0
libtpu: 0.0.40
codegen_flags: <defaults>
</compile_context>

<pallas_src>
import jax
import jax.numpy as jnp
from jax.experimental import pallas as pl
from jax.experimental.pallas import tpu as pltpu


# ---------------- config (stand-in for the original `cfg`) ----------------
class cfg:
    feature_space = 32   # decoder input width
    sequence = 8         # batch size used in the example


HIDDEN = 128             # nn.Linear(cfg.feature_space, 128)
OUT_DIM = 3              # nn.Linear(128, 3)


# ------------------------------ Pallas kernel ------------------------------
def _decoder_kernel(x_ref, w1_ref, b1_ref, w2_ref, b2_ref, o_ref):
    """o = pi * tanh(relu(x @ W1t + b1) @ W2t + b2), one shot, all in VMEM.

    x_ref : (B, F)      input features
    w1_ref: (F, 128)    first Linear weight, transposed
    b1_ref: (1, 128)
    w2_ref: (128, 3)    second Linear weight, transposed
    b2_ref: (1, 3)
    o_ref : (B, 3)
    """
    x = x_ref[...]
    h = jnp.dot(x, w1_ref[...], preferred_element_type=jnp.float32) + b1_ref[...]
    h = jnp.maximum(h, 0.0)                                    # ReLU (VPU)
    y = jnp.dot(h, w2_ref[...], preferred_element_type=jnp.float32) + b2_ref[...]
    o_ref[...] = (jnp.pi * jnp.tanh(y)).astype(o_ref.dtype)    # tanh (EUP), scale (VPU)


def _decoder_pallas(x2d, w1t, b1, w2t, b2):
    B = x2d.shape[0]
    vmem = pl.BlockSpec(memory_space=pltpu.MemorySpace.VMEM)
    return pl.pallas_call(
        _decoder_kernel,
        out_shape=jax.ShapeDtypeStruct((B, OUT_DIM), jnp.float32),
        in_specs=[vmem, vmem, vmem, vmem, vmem],
        out_specs=vmem,
    )(x2d, w1t, b1, w2t, b2)


# ------------------------------ wrapper ------------------------------------
@jax.jit
def model_ego_decoder_forward(x, params):
    """Replicates model_ego_decoder.forward(x): pi * Sequential(...)(x).

    Like nn.Linear, accepts any leading dims: x has shape (..., feature_space).
    Params use the PyTorch nn.Linear layout: w1 (128, F), b1 (128,),
    w2 (3, 128), b2 (3,).  All prep (transpose / reshape) is inside this jit
    so the host issues a single program.
    """
    lead = x.shape[:-1]
    x2d = x.reshape((-1, x.shape[-1])).astype(jnp.float32)
    out = _decoder_pallas(
        x2d,
        params["w1"].T.astype(jnp.float32),        # (F, 128)
        params["b1"][None, :].astype(jnp.float32), # (1, 128)
        params["w2"].T.astype(jnp.float32),        # (128, 3)
        params["b2"][None, :].astype(jnp.float32), # (1, 3)
    )
    return out.reshape(lead + (OUT_DIM,))


# ------------------------- deterministic params -----------------------------
def init_params(key, feature_space=cfg.feature_space, hidden=HIDDEN, out_dim=OUT_DIM):
    """PyTorch nn.Linear-style init: U(-1/sqrt(fan_in), 1/sqrt(fan_in))."""
    k1, k2, k3, k4 = jax.random.split(key, 4)
    s1 = 1.0 / jnp.sqrt(feature_space)
    s2 = 1.0 / jnp.sqrt(hidden)
    return {
        "w1": jax.random.uniform(k1, (hidden, feature_space), jnp.float32, -s1, s1),
        "b1": jax.random.uniform(k2, (hidden,), jnp.float32, -s1, s1),
        "w2": jax.random.uniform(k3, (out_dim, hidden), jnp.float32, -s2, s2),
        "b2": jax.random.uniform(k4, (out_dim,), jnp.float32, -s2, s2),
    }


# ------------------------------ reference -----------------------------------
def _reference(x, params):
    """Pure-JAX replica of the PyTorch forward."""
    h = jnp.maximum(x @ params["w1"].T + params["b1"], 0.0)
    y = h @ params["w2"].T + params["b2"]
    return jnp.pi * jnp.tanh(y)


if __name__ == "__main__":
    key = jax.random.PRNGKey(0)
    kp, kx = jax.random.split(key)

    params = init_params(kp)

    B = cfg.sequence                                        # batch = 8
    x = jax.random.normal(kx, (B, cfg.feature_space), dtype=jnp.float32)

    out = model_ego_decoder_forward(x, params)
    out = jax.block_until_ready(out)

    ref = _reference(x, params)
    assert out.shape == (B, OUT_DIM)
    assert jnp.allclose(out, ref, atol=1e-5, rtol=1e-5), "mismatch vs reference"

    print("KERNEL_OK")
</pallas_src>

<mosaic_0001>
module attributes {stable_mosaic.version = 11 : i64} {
  func.func @_decoder_kernel(%arg0: memref<8x32xf32, #tpu.memory_space<vmem>>, %arg1: memref<32x128xf32, #tpu.memory_space<vmem>>, %arg2: memref<1x128xf32, #tpu.memory_space<vmem>>, %arg3: memref<128x3xf32, #tpu.memory_space<vmem>>, %arg4: memref<1x3xf32, #tpu.memory_space<vmem>>, %arg5: memref<8x3xf32, #tpu.memory_space<vmem>>) attributes {dimension_semantics = [], scalar_prefetch = 0 : i64, scratch_operands = 0 : i64, tpu.core_type = #tpu.core_type<tc>} {
    %c0 = arith.constant 0 : index
    %c0_0 = arith.constant 0 : index
    %0 = vector.load %arg0[%c0, %c0_0] : memref<8x32xf32, #tpu.memory_space<vmem>>, vector<8x32xf32>
    %c0_1 = arith.constant 0 : index
    %c0_2 = arith.constant 0 : index
    %1 = vector.load %arg1[%c0_1, %c0_2] : memref<32x128xf32, #tpu.memory_space<vmem>>, vector<32x128xf32>
    %cst = arith.constant dense<0.000000e+00> : vector<8x128xf32>
    %2 = tpu.matmul %0, %1, %cst {dimension_numbers = #tpu.dot_dimension_numbers<[1], [0], [0], [1], [0, 0, 1, 1], [], []>} : vector<8x32xf32>, vector<32x128xf32>, vector<8x128xf32> -> vector<8x128xf32>
    %c0_3 = arith.constant 0 : index
    %c0_4 = arith.constant 0 : index
    %3 = vector.load %arg2[%c0_3, %c0_4] : memref<1x128xf32, #tpu.memory_space<vmem>>, vector<1x128xf32>
    %4 = vector.broadcast %3 : vector<1x128xf32> to vector<8x128xf32>
    %5 = arith.addf %2, %4 : vector<8x128xf32>
    %cst_5 = arith.constant 0.000000e+00 : f32
    %6 = vector.broadcast %cst_5 : f32 to vector<8x128xf32>
    %7 = arith.maximumf %5, %6 : vector<8x128xf32>
    %c0_6 = arith.constant 0 : index
    %c0_7 = arith.constant 0 : index
    %8 = vector.load %arg3[%c0_6, %c0_7] : memref<128x3xf32, #tpu.memory_space<vmem>>, vector<128x3xf32>
    %cst_8 = arith.constant dense<0.000000e+00> : vector<8x3xf32>
    %9 = tpu.matmul %7, %8, %cst_8 {dimension_numbers = #tpu.dot_dimension_numbers<[1], [0], [0], [1], [0, 0, 1, 1], [], []>} : vector<8x128xf32>, vector<128x3xf32>, vector<8x3xf32> -> vector<8x3xf32>
    %c0_9 = arith.constant 0 : index
    %c0_10 = arith.constant 0 : index
    %10 = vector.load %arg4[%c0_9, %c0_10] : memref<1x3xf32, #tpu.memory_space<vmem>>, vector<1x3xf32>
    %11 = vector.broadcast %10 : vector<1x3xf32> to vector<8x3xf32>
    %12 = arith.addf %9, %11 : vector<8x3xf32>
    %13 = math.tanh %12 : vector<8x3xf32>
    %cst_11 = arith.constant 3.14159274 : f32
    %14 = vector.broadcast %cst_11 : f32 to vector<8x3xf32>
    %15 = arith.mulf %14, %13 : vector<8x3xf32>
    %c0_12 = arith.constant 0 : index
    %c0_13 = arith.constant 0 : index
    %16 = vector.load %arg5[%c0_12, %c0_13] : memref<8x3xf32, #tpu.memory_space<vmem>>, vector<8x3xf32>
    tpu.vector_store %arg5[%c0_12, %c0_13], %15 {strides = array<i32>} : memref<8x3xf32, #tpu.memory_space<vmem>>, vector<8x3xf32>,
    return
  }
}

</mosaic_0001>

<bundles_post_ra>
// kernel: model_ego_decoder_forward.1
= control target key start
LH: loop header
LB: loop body
LE: loop exit
PB: predicated region body
PF: predicated region fallthrough
CT: control target
= control target key end

     0   :  { %v314_v0 = vmov 0.0|0.0   ;;  %vm315_vm0 = vmmov 0   ;;  %v316_v4 = vmov 0.0   ;;  %vm32_vm1 = vcmask 261120   ;;  %s419_s1 = inlined_call_operand.vmem [shape: f32[32,128], index: 1, kind: input, shape index: {}]   ;;  %s420_s3 = inlined_call_operand.vmem [shape: f32[128,3], index: 3, kind: input, shape index: {}]   ;;  %s421_s0 = inlined_call_operand.vmem [shape: f32[8,32], index: 0, kind: input, shape index: {}]   ;;  %s422_s2 = inlined_call_operand.vmem [shape: f32[1,128], index: 2, kind: input, shape index: {}]   ;;  %s423_s4 = inlined_call_operand.vmem [shape: f32[1,3], index: 4, kind: input, shape index: {}]   ;;  %s424_s5 = inlined_call_operand.vmem [shape: f32[8,3], index: 5, kind: output, shape index: {}]  }
   0x1   :  { %279 = vmatprep.subr.bf16.mxu0 %v314_v0  ;;  %v21_v1 = vld [vmem:[%s419_s1] sm:$0xff]  ;;  %v22_v2 = vld [vmem:[%s419_s1 + $0x8] sm:$0xff]  ;;  %v23_v3 = vld [vmem:[%s419_s1 + $0x10] sm:$0xff]  ;;  %241 = vmatprep.mubr.msk.f32.mxu0 %vm315_vm0, %v316_v4  ;;  %vm202_vm2 = vcmask 23552  }
   0x2   :  { %v280_v5 = vpack.c.bf16 %v22_v2, %v21_v1  ;;  %v24_v6 = vld [vmem:[%s419_s1 + $0x18] sm:$0xff]  ;;  %285 = vmatprep.subr.bf16.mxu1 %v314_v0  ;;  %v107_v7 = vld [vmem:[%s420_s3] sm:$0xff]  ;;  %276 = vmatprep.mubr.msk.f32.mxu1 %vm315_vm0, %v316_v4  ;;  %v108_v8 = vld [vmem:[%s420_s3 + $0x8] sm:$0xff] }
   0x3   :  { %v109_v9 = vld [vmem:[%s420_s3 + $0x10] sm:$0xff]  ;;  %v110_v10 = vld [vmem:[%s420_s3 + $0x18] sm:$0xff]  ;;  %v283_v11 = vpack.c.bf16 %v24_v6, %v23_v3  ;;  %v286_v12 = vpack.c.bf16 %v108_v8, %v107_v7  ;;  %v111_v14 = vld [vmem:[%s420_s3 + $0x20] sm:$0xff] }
   0x4   :  { %281 = vmatpush3.bf16.msra.mxu0 %v280_v5  ;;  %v289_v13 = vpack.c.bf16 %v110_v10, %v109_v9  ;;  %v112_v15 = vld [vmem:[%s420_s3 + $0x28] sm:$0xff]  ;;  %v20_v16 = vld [vmem:[%s421_s0] sm:$0xff]  ;;  %v113_v18 = vld [vmem:[%s420_s3 + $0x30] sm:$0xff] }
   0x5   :  { %282 = vmatprep.subr.bf16.mxu0 %v314_v0  ;;  %287 = vmatpush3.bf16.msra.mxu1 %v286_v12  ;;  %v292_v17 = vpack.c.bf16 %v112_v15, %v111_v14  ;;  %v114_v19 = vld [vmem:[%s420_s3 + $0x38] sm:$0xff]  ;;  %v115_v21 = vld [vmem:[%s420_s3 + $0x40] sm:$0xff]  ;;  %v116_v22 = vld [vmem:[%s420_s3 + $0x48] sm:$0xff] }
   0x6   :  { %288 = vmatprep.subr.bf16.mxu1 %v314_v0  ;;  %v295_v20 = vpack.c.bf16 %v114_v19, %v113_v18  ;;  %v298_v23 = vpack.c.bf16 %v116_v22, %v115_v21  ;;  %v117_v24 = vld [vmem:[%s420_s3 + $0x50] sm:$0xff]  ;;  %v118_v25 = vld [vmem:[%s420_s3 + $0x58] sm:$0xff]  ;;  %v119_v27 = vld [vmem:[%s420_s3 + $0x60] sm:$0xff] }
   0x7   :  { %v301_v26 = vpack.c.bf16 %v118_v25, %v117_v24  ;;  %v120_v28 = vld [vmem:[%s420_s3 + $0x68] sm:$0xff]  ;;  %v121_v30 = vld [vmem:[%s420_s3 + $0x70] sm:$0xff]  ;;  %v122_v31 = vld [vmem:[%s420_s3 + $0x78] sm:$0xff] }
   0x8   :  { %284 = vmatpush3.bf16.msra.mxu0 %v283_v11  ;;  %v304_v29 = vpack.c.bf16 %v120_v28, %v119_v27  ;;  %v307_v32 = vpack.c.bf16 %v122_v31, %v121_v30  ;;  %v208_v33 = vld [vmem:[%s422_s2] ss:$0 sm:$0xff] }
   0x9   :  { %290 = vmatpush3.bf16.msra.mxu1 %v289_v13  ;;  %v210_v38 = vld [vmem:[%s423_s4] ss:$0 sm:$0xff] }
   0xa   :  { %291 = vmatprep.subr.bf16.mxu1 %v314_v0 }
   0xb   :  { %242 = vmatmul.mubr.msk.f32.vlgmr.msra.gmra.mrb[0].mxu0 %vm32_vm1, %v20_v16 }
   0xd   :  { %293 = vmatpush3.bf16.msra.mxu1 %v292_v17 }
   0xe   :  { %294 = vmatprep.subr.bf16.mxu1 %v314_v0 }
  0x11   :  { %296 = vmatpush3.bf16.msra.mxu1 %v295_v20 }
  0x12   :  { %297 = vmatprep.subr.bf16.mxu1 %v314_v0 }
  0x15   :  { %299 = vmatpush3.bf16.msra.mxu1 %v298_v23 }
  0x16   :  { %300 = vmatprep.subr.bf16.mxu1 %v314_v0 }
  0x19   :  { %302 = vmatpush3.bf16.msra.mxu1 %v301_v26 }
  0x1a   :  { %303 = vmatprep.subr.bf16.mxu1 %v314_v0 }
  0x1d   :  { %305 = vmatpush3.bf16.msra.mxu1 %v304_v29 }
  0x1e   :  { %306 = vmatprep.subr.bf16.mxu1 %v314_v0 }
  0x21   :  { %308 = vmatpush3.bf16.msra.mxu1 %v307_v32 }
  0xde   :  { %v102_v34 = vpop.f32.mrb[0].mxu0 }
  0xdf   :  { %v103_v35 = vadd.f32 %v208_v33, %v102_v34  ;;  %v243_v36 = vpop.f32.mrb[1].mxu0 }
  0xe1   :  { %v106_v37 = vmax.f32 %v103_v35, 0.0 }
  0xe3   :  { %277 = vmatmul.mubr.f32.vlgmr.msra.gmra.mrb[0].mxu1 %v106_v37 }
 0x1b6   :  { %v196_v39 = vpop.f32.mrb[0].mxu1 }
 0x1b7   :  { %v197_v40 = vadd.f32 %v210_v38, %v196_v39  ;;  %v278_v41 = vpop.f32.mrb[1].mxu1 }
 0x1b9   :  { %312 = vtanh.f32 %v197_v40 }
 0x1c3   :  { %v313_v42 = vpop.eup %312 }
 0x1c4   :  { %v201_v43 = vmul.f32 3.1415927, %v313_v42 }
 0x1c6   :  { %203 = vst.msk [vmem:[%s424_s5] sm:$0xff] %vm202_vm2, %v201_v43 }

</bundles_post_ra>
